<compile_context>
chip_gen: v6e
topology: v6e:2x2x1
jax: 0.10.0
libtpu: 0.0.40
codegen_flags: <defaults>
</compile_context>

<pallas_src>
import functools

import jax
import jax.numpy as jnp
from jax.experimental import pallas as pl
from jax.experimental.pallas import tpu as pltpu


def _round_up(x: int, m: int) -> int:
    return ((x + m - 1) // m) * m


# ---------------------------------------------------------------------------
# Kernel 1: feature transform  XW = X @ W^T
# ---------------------------------------------------------------------------
def _xw_kernel(x_ref, wt_ref, out_ref):
    # x_ref  : [tm, Fi]   tile of node features
    # wt_ref : [Fi, Fo]   W^T (whole, padded lane-dense)
    # out_ref: [tm, Fo]
    out_ref[...] = jnp.dot(
        x_ref[...], wt_ref[...], preferred_element_type=jnp.float32
    ).astype(out_ref.dtype)


def feature_transform_pallas(x, w_t, *, tm=128):
    """x: [Np, Fi], w_t: [Fi, Fo] -> [Np, Fo]. Dims already padded."""
    Np, Fi = x.shape
    Fo = w_t.shape[1]
    assert Np % tm == 0 and Fi % 128 == 0 and Fo % 128 == 0
    return pl.pallas_call(
        _xw_kernel,
        out_shape=jax.ShapeDtypeStruct((Np, Fo), x.dtype),
        grid=(Np // tm,),
        in_specs=[
            pl.BlockSpec((tm, Fi), lambda i: (i, 0)),   # X
            pl.BlockSpec((Fi, Fo), lambda i: (0, 0)),   # W^T
        ],
        out_specs=pl.BlockSpec((tm, Fo), lambda i: (i, 0)),
        compiler_params=pltpu.CompilerParams(
            dimension_semantics=("parallel",)),
    )(x, w_t)


# ---------------------------------------------------------------------------
# Kernel 2: aggregation + epilogue  out = PReLU(A_hat @ XW + b)
# ---------------------------------------------------------------------------
def _agg_kernel(a_ref, xw_ref, b_ref, alpha_ref, out_ref, acc_ref):
    # a_ref     : [tm, tk]  tile of normalized adjacency        (VMEM)
    # xw_ref    : [tk, Fo]  tile of transformed features        (VMEM)
    # b_ref     : [1,  Fo]  bias                                (VMEM)
    # alpha_ref : [1, 1]    PReLU slope                         (SMEM)
    # out_ref   : [tm, Fo]  output tile (resident across k)
    # acc_ref   : [tm, Fo]  f32 accumulator scratch
    k = pl.program_id(1)

    @pl.when(k == 0)
    def _():
        acc_ref[...] = jnp.zeros_like(acc_ref)

    acc_ref[...] += jnp.dot(
        a_ref[...], xw_ref[...], preferred_element_type=jnp.float32)

    @pl.when(k == pl.num_programs(1) - 1)
    def _():
        z = acc_ref[...] + b_ref[...]
        alpha = alpha_ref[0, 0]
        out_ref[...] = jnp.where(z >= 0, z, alpha * z).astype(out_ref.dtype)


def aggregate_pallas(a_hat, xw, b, alpha, *, tm=128, tk=128):
    """a_hat: [Np, Np], xw: [Np, Fo], b: [1, Fo], alpha: [1,1] -> [Np, Fo]."""
    Np, Fo = xw.shape
    assert a_hat.shape == (Np, Np)
    assert Np % tm == 0 and Np % tk == 0 and Fo % 128 == 0

    grid = (Np // tm, Np // tk)   # reduction (node contraction) axis last
    return pl.pallas_call(
        _agg_kernel,
        out_shape=jax.ShapeDtypeStruct((Np, Fo), xw.dtype),
        grid=grid,
        in_specs=[
            pl.BlockSpec((tm, tk), lambda i, k: (i, k)),        # A_hat
            pl.BlockSpec((tk, Fo), lambda i, k: (k, 0)),        # XW
            pl.BlockSpec((1, Fo), lambda i, k: (0, 0)),         # bias
            pl.BlockSpec(memory_space=pltpu.MemorySpace.SMEM),  # PReLU slope
        ],
        out_specs=pl.BlockSpec((tm, Fo), lambda i, k: (i, 0)),
        scratch_shapes=[pltpu.VMEM((tm, Fo), jnp.float32)],
        compiler_params=pltpu.CompilerParams(
            dimension_semantics=("parallel", "arbitrary")),
    )(a_hat, xw, b, alpha)


def gcn_layer_pallas(a_hat, x, w_t, b, alpha, *, tm=128, tk=128):
    """One GCNConv + PReLU layer: PReLU(A_hat @ (X @ W^T) + b)."""
    xw = feature_transform_pallas(x, w_t, tm=tm)
    return aggregate_pallas(a_hat, xw, b, alpha, tm=tm, tk=tk)


# ---------------------------------------------------------------------------
# Graph preprocessing (pure JAX) + full forward
# ---------------------------------------------------------------------------
def build_norm_adj(edge_index, edge_weight, num_nodes):
    """Dense symmetric-normalized adjacency with self loops (PyG gcn_norm)."""
    # TODO(synk): the irregular edge scatter-add has no clean Pallas TPU
    # equivalent; it is built with a JAX scatter outside the kernels.
    src = edge_index[0]
    dst = edge_index[1]
    if edge_weight is None:
        edge_weight = jnp.ones(src.shape[0], jnp.float32)
    a = jnp.zeros((num_nodes, num_nodes), jnp.float32)
    a = a.at[dst, src].add(edge_weight.astype(jnp.float32))
    a = a + jnp.eye(num_nodes, dtype=jnp.float32)
    deg = jnp.sum(a, axis=1)
    dinv = jnp.where(deg > 0, jax.lax.rsqrt(deg), 0.0)
    return a * dinv[:, None] * dinv[None, :]


@functools.partial(jax.jit, static_argnames=("tm", "tk"))
def gcn_forward(x, a_hat, w1, b1, a1, w2, b2, a2, *, tm=128, tk=128):
    """Two GCNConv+PReLU layers; returns (h1, h2) like the PyTorch module."""
    N, Fi = x.shape
    Fo1 = w1.shape[0]
    Fo2 = w2.shape[0]

    # Pad nodes to the tile size and features to multiples of 128 so every
    # kernel operand / output slab is lane-dense (unmasked vst) and blocks
    # satisfy the (8, 128) constraint. Zero padding is exact: padded rows of
    # A_hat / cols of W contribute nothing to the valid outputs.
    Np = _round_up(N, max(tm, tk, 128))
    Fip = _round_up(Fi, 128)
    Fo1p = _round_up(Fo1, 128)
    Fo2p = _round_up(Fo2, 128)

    dt = x.dtype
    a_pad = jnp.zeros((Np, Np), dt).at[:N, :N].set(a_hat.astype(dt))
    x_pad = jnp.zeros((Np, Fip), dt).at[:N, :Fi].set(x)
    w1_t = jnp.zeros((Fip, Fo1p), dt).at[:Fi, :Fo1].set(w1.T.astype(dt))
    b1_p = jnp.zeros((1, Fo1p), dt).at[0, :Fo1].set(b1.astype(dt))
    w2_t = jnp.zeros((Fo1p, Fo2p), dt).at[:Fo1, :Fo2].set(w2.T.astype(dt))
    b2_p = jnp.zeros((1, Fo2p), dt).at[0, :Fo2].set(b2.astype(dt))
    a1_s = a1.reshape(1, 1).astype(jnp.float32)
    a2_s = a2.reshape(1, 1).astype(jnp.float32)

    h1_pad = gcn_layer_pallas(a_pad, x_pad, w1_t, b1_p, a1_s, tm=tm, tk=tk)
    h2_pad = gcn_layer_pallas(a_pad, h1_pad, w2_t, b2_p, a2_s, tm=tm, tk=tk)
    return h1_pad[:N, :Fo1], h2_pad[:N, :Fo2]


# ---------------------------------------------------------------------------
# Pure-JAX reference mirroring the PyTorch forward
# ---------------------------------------------------------------------------
def _prelu(v, a):
    return jnp.where(v >= 0, v, a * v)


def gcn_reference(x, a_hat, w1, b1, a1, w2, b2, a2):
    hp = jax.lax.Precision.HIGHEST
    h1 = _prelu(jnp.dot(a_hat, jnp.dot(x, w1.T, precision=hp), precision=hp)
                + b1, a1[0])
    h2 = _prelu(jnp.dot(a_hat, jnp.dot(h1, w2.T, precision=hp), precision=hp)
                + b2, a2[0])
    return h1, h2


if __name__ == "__main__":
    # Small, module-consistent shapes: 200 nodes, 800 edges,
    # in_channels=16, out_channels=32. Padded internally to 256 nodes /
    # 128 features -> a real (2, 2) aggregation grid exercising the
    # accumulator / epilogue path.
    N, E, F_IN, F_OUT = 200, 800, 16, 32

    key = jax.random.PRNGKey(0)
    kx, ke1, ke2, kew, kw1, kb1, kw2, kb2 = jax.random.split(key, 8)

    x = jax.random.normal(kx, (N, F_IN), dtype=jnp.float32)
    src = jax.random.randint(ke1, (E,), 0, N)
    dst = jax.random.randint(ke2, (E,), 0, N)
    edge_index = jnp.stack([src, dst])
    edge_weight = jax.random.uniform(kew, (E,), dtype=jnp.float32,
                                     minval=0.5, maxval=1.5)

    # GCNConv-style params: W [out, in], bias, PReLU slope 0.25 (torch default).
    w1 = jax.random.normal(kw1, (F_OUT, F_IN), jnp.float32) / jnp.sqrt(F_IN)
    b1 = jax.random.uniform(kb1, (F_OUT,), jnp.float32, -0.1, 0.1)
    w2 = jax.random.normal(kw2, (F_OUT, F_OUT), jnp.float32) / jnp.sqrt(F_OUT)
    b2 = jax.random.uniform(kb2, (F_OUT,), jnp.float32, -0.1, 0.1)
    a1 = jnp.array([0.25], jnp.float32)
    a2 = jnp.array([0.25], jnp.float32)

    a_hat = build_norm_adj(edge_index, edge_weight, N)

    h1, h2 = gcn_forward(x, a_hat, w1, b1, a1, w2, b2, a2)
    h1, h2 = jax.block_until_ready((h1, h2))

    h1_ref, h2_ref = gcn_reference(x, a_hat, w1, b1, a1, w2, b2, a2)

    assert h1.shape == (N, F_OUT) and h2.shape == (N, F_OUT)
    assert jnp.allclose(h1, h1_ref, atol=1e-4, rtol=1e-4), \
        f"h1 max abs err = {jnp.max(jnp.abs(h1 - h1_ref))}"
    assert jnp.allclose(h2, h2_ref, atol=1e-4, rtol=1e-4), \
        f"h2 max abs err = {jnp.max(jnp.abs(h2 - h2_ref))}"

    print("KERNEL_OK")
</pallas_src>

<mosaic_0001>
module attributes {stable_mosaic.version = 11 : i64} {
  func.func @_xw_kernel(%arg0: i32, %arg1: memref<128x128xf32, #tpu.memory_space<vmem>>, %arg2: memref<128x128xf32, #tpu.memory_space<vmem>>, %arg3: memref<128x128xf32, #tpu.memory_space<vmem>>) attributes {dimension_semantics = [#tpu.dimension_semantics<parallel>], iteration_bounds = array<i64: 2>, scalar_prefetch = 0 : i64, scratch_operands = 0 : i64, tpu.core_type = #tpu.core_type<tc>, window_params = [{transform_indices = @transform_0, window_bounds = array<i64: 128, 128>}, {pipeline_mode = #tpu.pipeline_mode<synchronous>, transform_indices = @transform_1, window_bounds = array<i64: 128, 128>}, {transform_indices = @transform_2, window_bounds = array<i64: 128, 128>}]} {
    %c0 = arith.constant 0 : index
    %c0_0 = arith.constant 0 : index
    %0 = vector.load %arg1[%c0, %c0_0] : memref<128x128xf32, #tpu.memory_space<vmem>>, vector<128x128xf32>
    %c0_1 = arith.constant 0 : index
    %c0_2 = arith.constant 0 : index
    %1 = vector.load %arg2[%c0_1, %c0_2] : memref<128x128xf32, #tpu.memory_space<vmem>>, vector<128x128xf32>
    %cst = arith.constant dense<0.000000e+00> : vector<128x128xf32>
    %2 = tpu.matmul %0, %1, %cst {dimension_numbers = #tpu.dot_dimension_numbers<[1], [0], [0], [1], [0, 0, 1, 1], [], []>} : vector<128x128xf32>, vector<128x128xf32>, vector<128x128xf32> -> vector<128x128xf32>
    %c0_3 = arith.constant 0 : index
    %c0_4 = arith.constant 0 : index
    %3 = vector.load %arg3[%c0_3, %c0_4] : memref<128x128xf32, #tpu.memory_space<vmem>>, vector<128x128xf32>
    tpu.vector_store %arg3[%c0_3, %c0_4], %2 {strides = array<i32>} : memref<128x128xf32, #tpu.memory_space<vmem>>, vector<128x128xf32>,
    return
  }
  func.func @transform_0(%arg0: i32) -> (i32, i32) {
    %c0_i32 = arith.constant 0 : i32
    %c0_i32_0 = arith.constant 0 : i32
    return %arg0, %c0_i32 : i32, i32
  }
  func.func @transform_1(%arg0: i32) -> (i32, i32) {
    %c0_i32 = arith.constant 0 : i32
    %c0_i32_0 = arith.constant 0 : i32
    %c0_i32_1 = arith.constant 0 : i32
    return %c0_i32, %c0_i32_0 : i32, i32
  }
  func.func @transform_2(%arg0: i32) -> (i32, i32) {
    %c0_i32 = arith.constant 0 : i32
    %c0_i32_0 = arith.constant 0 : i32
    return %arg0, %c0_i32 : i32, i32
  }
}

module attributes {stable_mosaic.version = 11 : i64} {
  func.func @_agg_kernel(%arg0: i32, %arg1: i32, %arg2: memref<128x128xf32, #tpu.memory_space<vmem>>, %arg3: memref<128x128xf32, #tpu.memory_space<vmem>>, %arg4: memref<1x128xf32, #tpu.memory_space<vmem>>, %arg5: memref<1x1xf32, #tpu.memory_space<smem>>, %arg6: memref<128x128xf32, #tpu.memory_space<vmem>>, %arg7: memref<128x128xf32, #tpu.memory_space<vmem>>) attributes {dimension_semantics = [#tpu.dimension_semantics<parallel>, #tpu.dimension_semantics<arbitrary>], iteration_bounds = array<i64: 2, 2>, scalar_prefetch = 0 : i64, scratch_operands = 1 : i64, tpu.core_type = #tpu.core_type<tc>, window_params = [{transform_indices = @transform_0, window_bounds = array<i64: 128, 128>}, {transform_indices = @transform_1, window_bounds = array<i64: 128, 128>}, {pipeline_mode = #tpu.pipeline_mode<synchronous>, transform_indices = @transform_2, window_bounds = array<i64: 1, 128>}, {transform_indices = @transform_3, window_bounds = array<i64: 1, 1>}, {transform_indices = @transform_4, window_bounds = array<i64: 128, 128>}]} {
    %c0_i32 = arith.constant 0 : i32
    %0 = arith.cmpi eq, %arg1, %c0_i32 : i32
    %1 = arith.extui %0 : i1 to i32
    %c0_i32_0 = arith.constant 0 : i32
    %2 = arith.cmpi ne, %1, %c0_i32_0 : i32
    scf.if %2 {
      %cst_9 = arith.constant 0.000000e+00 : f32
      %12 = vector.broadcast %cst_9 : f32 to vector<128x128xf32>
      %c0_10 = arith.constant 0 : index
      %c0_11 = arith.constant 0 : index
      %13 = vector.load %arg7[%c0_10, %c0_11] : memref<128x128xf32, #tpu.memory_space<vmem>>, vector<128x128xf32>
      tpu.vector_store %arg7[%c0_10, %c0_11], %12 {strides = array<i32>} : memref<128x128xf32, #tpu.memory_space<vmem>>, vector<128x128xf32>,
    } else {
    }
    %c0 = arith.constant 0 : index
    %c0_1 = arith.constant 0 : index
    %3 = vector.load %arg7[%c0, %c0_1] : memref<128x128xf32, #tpu.memory_space<vmem>>, vector<128x128xf32>
    %c0_2 = arith.constant 0 : index
    %c0_3 = arith.constant 0 : index
    %4 = vector.load %arg2[%c0_2, %c0_3] : memref<128x128xf32, #tpu.memory_space<vmem>>, vector<128x128xf32>
    %c0_4 = arith.constant 0 : index
    %c0_5 = arith.constant 0 : index
    %5 = vector.load %arg3[%c0_4, %c0_5] : memref<128x128xf32, #tpu.memory_space<vmem>>, vector<128x128xf32>
    %cst = arith.constant dense<0.000000e+00> : vector<128x128xf32>
    %6 = tpu.matmul %4, %5, %cst {dimension_numbers = #tpu.dot_dimension_numbers<[1], [0], [0], [1], [0, 0, 1, 1], [], []>} : vector<128x128xf32>, vector<128x128xf32>, vector<128x128xf32> -> vector<128x128xf32>
    %7 = arith.addf %3, %6 : vector<128x128xf32>
    %c0_6 = arith.constant 0 : index
    %c0_7 = arith.constant 0 : index
    %8 = vector.load %arg7[%c0_6, %c0_7] : memref<128x128xf32, #tpu.memory_space<vmem>>, vector<128x128xf32>
    tpu.vector_store %arg7[%c0_6, %c0_7], %7 {strides = array<i32>} : memref<128x128xf32, #tpu.memory_space<vmem>>, vector<128x128xf32>,
    %c1_i32 = arith.constant 1 : i32
    %9 = arith.cmpi eq, %arg1, %c1_i32 : i32
    %10 = arith.extui %9 : i1 to i32
    %c0_i32_8 = arith.constant 0 : i32
    %11 = arith.cmpi ne, %10, %c0_i32_8 : i32
    scf.if %11 {
      %c0_9 = arith.constant 0 : index
      %c0_10 = arith.constant 0 : index
      %12 = vector.load %arg7[%c0_9, %c0_10] : memref<128x128xf32, #tpu.memory_space<vmem>>, vector<128x128xf32>
      %c0_11 = arith.constant 0 : index
      %c0_12 = arith.constant 0 : index
      %13 = vector.load %arg4[%c0_11, %c0_12] : memref<1x128xf32, #tpu.memory_space<vmem>>, vector<1x128xf32>
      %14 = vector.broadcast %13 : vector<1x128xf32> to vector<128x128xf32>
      %15 = arith.addf %12, %14 : vector<128x128xf32>
      %c0_13 = arith.constant 0 : index
      %c0_14 = arith.constant 0 : index
      %16 = memref.load %arg5[%c0_13, %c0_14] : memref<1x1xf32, #tpu.memory_space<smem>>
      %cst_15 = arith.constant 0.000000e+00 : f32
      %17 = vector.broadcast %cst_15 : f32 to vector<128x128xf32>
      %18 = arith.cmpf oge, %15, %17 : vector<128x128xf32>
      %19 = vector.broadcast %16 : f32 to vector<128x128xf32>
      %20 = arith.mulf %19, %15 : vector<128x128xf32>
      %21 = arith.select %18, %15, %20 : vector<128x128xi1>, vector<128x128xf32>
      %c0_16 = arith.constant 0 : index
      %c0_17 = arith.constant 0 : index
      %22 = vector.load %arg6[%c0_16, %c0_17] : memref<128x128xf32, #tpu.memory_space<vmem>>, vector<128x128xf32>
      tpu.vector_store %arg6[%c0_16, %c0_17], %21 {strides = array<i32>} : memref<128x128xf32, #tpu.memory_space<vmem>>, vector<128x128xf32>,
    } else {
    }
    return
  }
  func.func @transform_0(%arg0: i32, %arg1: i32) -> (i32, i32) {
    %c0_i32 = arith.constant 0 : i32
    return %arg0, %arg1 : i32, i32
  }
  func.func @transform_1(%arg0: i32, %arg1: i32) -> (i32, i32) {
    %c0_i32 = arith.constant 0 : i32
    %c0_i32_0 = arith.constant 0 : i32
    return %arg1, %c0_i32 : i32, i32
  }
  func.func @transform_2(%arg0: i32, %arg1: i32) -> (i32, i32) {
    %c0_i32 = arith.constant 0 : i32
    %c0_i32_0 = arith.constant 0 : i32
    %c0_i32_1 = arith.constant 0 : i32
    return %c0_i32, %c0_i32_0 : i32, i32
  }
  func.func @transform_3(%arg0: i32, %arg1: i32) -> (i32, i32) {
    %c0_i32 = arith.constant 0 : i32
    %c0_i32_0 = arith.constant 0 : i32
    %c0_i32_1 = arith.constant 0 : i32
    return %c0_i32, %c0_i32_0 : i32, i32
  }
  func.func @transform_4(%arg0: i32, %arg1: i32) -> (i32, i32) {
    %c0_i32 = arith.constant 0 : i32
    %c0_i32_0 = arith.constant 0 : i32
    return %arg0, %c0_i32 : i32, i32
  }
}

</mosaic_0001>

<bundles_post_ra>
// kernel: gcn_forward.4
= control target key start
LH: loop header
LB: loop body
LE: loop exit
PB: predicated region body
PF: predicated region fallthrough
CT: control target
= control target key end

     0   :  { %s558_s9 = smov 0   ;;  %s668_s0 = inlined_call_operand.vmem [shape: f32[256,128], index: 0, kind: input, shape index: {}]   ;;  %s669_s1 = inlined_call_operand.vmem [shape: f32[128,128], index: 1, kind: input, shape index: {}]   ;;  %s670_s2 = inlined_call_operand.vmem [shape: f32[256,128], index: 2, kind: output, shape index: {}]  }
   0x1 LB: > { %s396_s10 = sadd.s32 4294967295, %s541_s9   ;;  %p400_p0 = scmp.ge.s32.totalorder %s541_s9, 1  ;;  %s541_s9 = sphi %s558_s9, %s12_s9  }
   0x2   : > { %p113_p1 = scmp.lt.s32.totalorder %s541_s9, 3 }
   0x4   : > { %p114_p2 = pnand %p400_p0, %p113_p1 }
   0x5   : > { %s401_s27 = sshll.u32 (!%p114_p2), %s396_s10, 4 }
   0x6   : > { %117 = sbr.rel (%p114_p2) target bundleno = 253 (0xfd), region = 28  ;;  %p136_p3 = scmp.lt.s32.totalorder (!%p114_p2), %s401_s27, 31 }
   0xb   : > { %v178_v0 = vld [vmem:[%s669_s1 + $0x78] sm:$0xff]  ;;  %v177_v1 = vld [vmem:[%s669_s1 + $0x70] sm:$0xff]  ;;  %v176_v2 = vld [vmem:[%s669_s1 + $0x68] sm:$0xff]  ;;  %s672_s27 = smov (!%p136_p3, %s401_s27), 31 }
   0xc   : > { %439 = vmatprep.subr.mxu0 %v178_v0  ;;  %495 = vmatprep.subr.mxu1 %v178_v0  ;;  %v175_v3 = vld [vmem:[%s669_s1 + $0x60] sm:$0xff]  ;;  %v174_v4 = vld [vmem:[%s669_s1 + $0x58] sm:$0xff]  ;;  %v173_v5 = vld [vmem:[%s669_s1 + $0x50] sm:$0xff]  ;;  %s402_s13 = sshll.u32 %s672_s27, 3 }
   0xd   : > { %440 = vmatpush3.msra.mxu0 %v178_v0  ;;  %511 = vmatpush3.msra.mxu1 %v178_v0  ;;  %v172_v6 = vld [vmem:[%s669_s1 + $0x48] sm:$0xff]  ;;  %v171_v7 = vld [vmem:[%s669_s1 + $0x40] sm:$0xff]  ;;  %v170_v8 = vld [vmem:[%s669_s1 + $0x38] sm:$0xff]  ;;  %s621_s18 = scalar_lea.vmem %s668_s0, %s402_s13  ;;  %s647_s23 = scalar_lea.vmem %s670_s2, %s402_s13 }
   0xe   : > { %441 = vmatprep.subr.mxu0 %v177_v1  ;;  %496 = vmatprep.subr.mxu1 %v177_v1  ;;  %v169_v9 = vld [vmem:[%s669_s1 + $0x30] sm:$0xff]  ;;  %v168_v10 = vld [vmem:[%s669_s1 + $0x28] sm:$0xff]  ;;  %v167_v11 = vld [vmem:[%s669_s1 + $0x20] sm:$0xff] }
   0xf   : > { %442 = vmatpush3.msra.mxu0 %v177_v1  ;;  %512 = vmatpush3.msra.mxu1 %v177_v1  ;;  %v166_v12 = vld [vmem:[%s669_s1 + $0x18] sm:$0xff]  ;;  %v165_v13 = vld [vmem:[%s669_s1 + $0x10] sm:$0xff]  ;;  %v164_v14 = vld [vmem:[%s669_s1 + $0x8] sm:$0xff] }
  0x10   : > { %443 = vmatprep.subr.mxu0 %v176_v2  ;;  %497 = vmatprep.subr.mxu1 %v176_v2  ;;  %v163_v15 = vld [vmem:[%s669_s1] sm:$0xff]  ;;  %v148_v18 = vld [vmem:[%s621_s18 + $0x8] sm:$0xff]  ;;  %v149_v20 = vld [vmem:[%s621_s18 + $0x10] sm:$0xff] }
  0x11   : > { %444 = vmatpush3.msra.mxu0 %v176_v2  ;;  %513 = vmatpush3.msra.mxu1 %v176_v2  ;;  %v147_v16 = vld [vmem:[%s621_s18] sm:$0xff]  ;;  %v156_v19 = vld [vmem:[%s621_s18 + $0x48] sm:$0xff]  ;;  %v157_v21 = vld [vmem:[%s621_s18 + $0x50] sm:$0xff] }
  0x12   : > { %445 = vmatprep.subr.mxu0 %v175_v3  ;;  %498 = vmatprep.subr.mxu1 %v175_v3  ;;  %v155_v17 = vld [vmem:[%s621_s18 + $0x40] sm:$0xff]  ;;  %v150_v22 = vld [vmem:[%s621_s18 + $0x18] sm:$0xff]  ;;  %v152_v26 = vld [vmem:[%s621_s18 + $0x28] sm:$0xff] }
  0x13   : > { %446 = vmatpush3.msra.mxu0 %v175_v3  ;;  %514 = vmatpush3.msra.mxu1 %v175_v3  ;;  %v158_v23 = vld [vmem:[%s621_s18 + $0x58] sm:$0xff]  ;;  %v151_v24 = vld [vmem:[%s621_s18 + $0x20] sm:$0xff]  ;;  %v160_v27 = vld [vmem:[%s621_s18 + $0x68] sm:$0xff] }
  0x14   : > { %447 = vmatprep.subr.mxu0 %v174_v4  ;;  %499 = vmatprep.subr.mxu1 %v174_v4  ;;  %v159_v25 = vld [vmem:[%s621_s18 + $0x60] sm:$0xff]  ;;  %v153_v28 = vld [vmem:[%s621_s18 + $0x30] sm:$0xff]  ;;  %v154_v30 = vld [vmem:[%s621_s18 + $0x38] sm:$0xff] }
  0x15   : > { %448 = vmatpush3.msra.mxu0 %v174_v4  ;;  %515 = vmatpush3.msra.mxu1 %v174_v4  ;;  %v161_v29 = vld [vmem:[%s621_s18 + $0x70] sm:$0xff]  ;;  %v162_v31 = vld [vmem:[%s621_s18 + $0x78] sm:$0xff] }
  0x16   : > { %449 = vmatprep.subr.mxu0 %v173_v5  ;;  %500 = vmatprep.subr.mxu1 %v173_v5 }
  0x17   : > { %450 = vmatpush3.msra.mxu0 %v173_v5  ;;  %516 = vmatpush3.msra.mxu1 %v173_v5 }
  0x18   : > { %451 = vmatprep.subr.mxu0 %v172_v6  ;;  %501 = vmatprep.subr.mxu1 %v172_v6 }
  0x19   : > { %452 = vmatpush3.msra.mxu0 %v172_v6  ;;  %517 = vmatpush3.msra.mxu1 %v172_v6 }
  0x1a   : > { %453 = vmatprep.subr.mxu0 %v171_v7  ;;  %502 = vmatprep.subr.mxu1 %v171_v7 }
  0x1b   : > { %454 = vmatpush3.msra.mxu0 %v171_v7  ;;  %518 = vmatpush3.msra.mxu1 %v171_v7 }
  0x1c   : > { %455 = vmatprep.subr.mxu0 %v170_v8  ;;  %503 = vmatprep.subr.mxu1 %v170_v8 }
  0x1d   : > { %456 = vmatpush3.msra.mxu0 %v170_v8  ;;  %519 = vmatpush3.msra.mxu1 %v170_v8 }
  0x1e   : > { %457 = vmatprep.subr.mxu0 %v169_v9  ;;  %504 = vmatprep.subr.mxu1 %v169_v9 }
  0x1f   : > { %458 = vmatpush3.msra.mxu0 %v169_v9  ;;  %520 = vmatpush3.msra.mxu1 %v169_v9 }
  0x20   : > { %459 = vmatprep.subr.mxu0 %v168_v10  ;;  %505 = vmatprep.subr.mxu1 %v168_v10 }
  0x21   : > { %460 = vmatpush3.msra.mxu0 %v168_v10  ;;  %521 = vmatpush3.msra.mxu1 %v168_v10 }
  0x22   : > { %461 = vmatprep.subr.mxu0 %v167_v11  ;;  %506 = vmatprep.subr.mxu1 %v167_v11 }
  0x23   : > { %462 = vmatpush3.msra.mxu0 %v167_v11  ;;  %522 = vmatpush3.msra.mxu1 %v167_v11 }
  0x24   : > { %463 = vmatprep.subr.mxu0 %v166_v12  ;;  %507 = vmatprep.subr.mxu1 %v166_v12 }
  0x25   : > { %464 = vmatpush3.msra.mxu0 %v166_v12  ;;  %523 = vmatpush3.msra.mxu1 %v166_v12 }
  0x26   : > { %465 = vmatprep.subr.mxu0 %v165_v13  ;;  %508 = vmatprep.subr.mxu1 %v165_v13 }
  0x27   : > { %466 = vmatpush3.msra.mxu0 %v165_v13  ;;  %524 = vmatpush3.msra.mxu1 %v165_v13 }
  0x28   : > { %467 = vmatprep.subr.mxu0 %v164_v14  ;;  %509 = vmatprep.subr.mxu1 %v164_v14 }
  0x29   : > { %468 = vmatpush3.msra.mxu0 %v164_v14  ;;  %525 = vmatpush3.msra.mxu1 %v164_v14 }
  0x2a   : > { %469 = vmatprep.subr.mxu0 %v163_v15  ;;  %510 = vmatprep.subr.mxu1 %v163_v15 }
  0x2b   : > { %470 = vmatpush3.msra.mxu0 %v163_v15  ;;  %526 = vmatpush3.msra.mxu1 %v163_v15 }
  0x2c   : > { %471 = vmatprep.mubr.f32.mxu0 %v147_v16  ;;  %483 = vmatprep.mubr.f32.mxu1 %v155_v17 }
  0x2d   : > { %472 = vmatmul.mubr.f32.vlgmr.msra.gmra.mxu0 %v148_v18  ;;  %484 = vmatmul.mubr.f32.vlgmr.msra.gmra.mxu1 %v156_v19 }
  0x2e   : > { %474 = vmatprep.mubr.f32.mxu0 %v149_v20  ;;  %486 = vmatprep.mubr.f32.mxu1 %v157_v21 }
  0x31   : > { %475 = vmatmul.mubr.f32.gmra.mxu0 %v150_v22  ;;  %487 = vmatmul.mubr.f32.gmra.mxu1 %v158_v23 }
  0x32   : > { %477 = vmatprep.mubr.f32.mxu0 %v151_v24  ;;  %489 = vmatprep.mubr.f32.mxu1 %v159_v25 }
  0x35   : > { %478 = vmatmul.mubr.f32.gmra.mxu0 %v152_v26  ;;  %490 = vmatmul.mubr.f32.gmra.mxu1 %v160_v27 }
  0x36   : > { %480 = vmatprep.mubr.f32.mxu0 %v153_v28  ;;  %492 = vmatprep.mubr.f32.mxu1 %v161_v29 }
  0x39   : > { %481 = vmatmul.mubr.f32.gmra.mxu0 %v154_v30  ;;  %493 = vmatmul.mubr.f32.gmra.mxu1 %v162_v31 }
  0xed   : > { %v473_v32 = vpop.f32.mrf.mxu0  ;;  %v485_v33 = vpop.f32.mrf.mxu1 }
  0xee   : > { %325 = vst [vmem:[%s647_s23 + $0x8] sm:$0xff] %v473_v32  ;;  %333 = vst [vmem:[%s647_s23 + $0x48] sm:$0xff] %v485_v33 }
  0xef   : > { %v245_v34 = vpop.f32.mrf.mxu0  ;;  %v285_v35 = vpop.f32.mrf.mxu1 }
  0xf0   : > { %324 = vst [vmem:[%s647_s23] sm:$0xff] %v245_v34  ;;  %332 = vst [vmem:[%s647_s23 + $0x40] sm:$0xff] %v285_v35 }
  0xf1   : > { %v476_v36 = vpop.f32.mrf.mxu0  ;;  %v488_v37 = vpop.f32.mrf.mxu1 }
  0xf2   : > { %327 = vst [vmem:[%s647_s23 + $0x18] sm:$0xff] %v476_v36  ;;  %335 = vst [vmem:[%s647_s23 + $0x58] sm:$0xff] %v488_v37 }
  0xf3   : > { %v255_v38 = vpop.f32.mrf.mxu0  ;;  %v295_v39 = vpop.f32.mrf.mxu1 }
  0xf4   : > { %326 = vst [vmem:[%s647_s23 + $0x10] sm:$0xff] %v255_v38  ;;  %334 = vst [vmem:[%s647_s23 + $0x50] sm:$0xff] %v295_v39 }
  0xf5   : > { %v479_v40 = vpop.f32.mrf.mxu0  ;;  %v491_v41 = vpop.f32.mrf.mxu1 }
  0xf6   : > { %329 = vst [vmem:[%s647_s23 + $0x28] sm:$0xff] %v479_v40  ;;  %337 = vst [vmem:[%s647_s23 + $0x68] sm:$0xff] %v491_v41 }
  0xf7   : > { %v265_v42 = vpop.f32.mrf.mxu0  ;;  %v305_v43 = vpop.f32.mrf.mxu1 }
  0xf8   : > { %328 = vst [vmem:[%s647_s23 + $0x20] sm:$0xff] %v265_v42  ;;  %336 = vst [vmem:[%s647_s23 + $0x60] sm:$0xff] %v305_v43 }
  0xf9   : > { %v482_v44 = vpop.f32.mrf.mxu0  ;;  %v494_v45 = vpop.f32.mrf.mxu1 }
  0xfa   : > { %331 = vst [vmem:[%s647_s23 + $0x38] sm:$0xff] %v482_v44  ;;  %339 = vst [vmem:[%s647_s23 + $0x78] sm:$0xff] %v494_v45 }
  0xfb   : > { %v275_v46 = vpop.f32.mrf.mxu0  ;;  %v315_v47 = vpop.f32.mrf.mxu1 }
  0xfc   : > { %330 = vst [vmem:[%s647_s23 + $0x30] sm:$0xff] %v275_v46  ;;  %338 = vst [vmem:[%s647_s23 + $0x70] sm:$0xff] %v315_v47 }
  0xfd PF: > { %s12_s9 = sadd.s32 1, %s541_s9  }
  0xfe   : > { %p9_p4 = scmp.ge.s32.totalorder %s12_s9, 4  }
 0x100   :  { %11 = sbr.rel (!%p9_p4) target bundleno = 1 (0x1), region = 58 }

// kernel: gcn_forward.5
= control target key start
LH: loop header
LB: loop body
LE: loop exit
PB: predicated region body
PF: predicated region fallthrough
CT: control target
= control target key end

     0   :  { %s1254_s0 = inlined_call_operand.vmem [shape: f32[256,256], index: 0, kind: input, shape index: {}]   ;;  %s1255_s1 = inlined_call_operand.vmem [shape: f32[256,128], index: 1, kind: input, shape index: {}]   ;;  %s1256_s2 = inlined_call_operand.vmem [shape: f32[1,128], index: 2, kind: input, shape index: {}]   ;;  %s1257_s3 = inlined_call_operand.<no memory space> [shape: f32[1,1], index: 3, kind: input, shape index: {}]   ;;  %s1258_s4 = inlined_call_operand.vmem [shape: f32[256,128], index: 4, kind: output, shape index: {}]  }
   0x1   :  { %9 = sst [smem:[#allocation3]] %s1257_s3 }
   0x2   :  { %s1059_s17 = smov 0   ;;  %s1061_s18 = smov 0  }
   0x3   :  { %s1063_s19 = smov 0   ;;  %s1065_s20 = smov 0  }
   0x4   :  { %s1067_s21 = smov 0   ;;  %s1069_s22 = smov 0  }
   0x5   :  { %s1071_s23 = smov 0  }
   0x6 LB: > { %s24_s3 = sadd.s32 1, %s1020_s21  ;;  %s27_s24 = sadd.s32 1, %s1024_s22  ;;  %s1028_s23 = sphi %s1071_s23, %s15_s23   ;;  %s1024_s22 = sphi %s1069_s22, %s1264_s22   ;;  %s1020_s21 = sphi %s1067_s21, %s1263_s21   ;;  %s1016_s20 = sphi %s1065_s20, %s1262_s20   ;;  %s1012_s19 = sphi %s1063_s19, %s1261_s19   ;;  %s1008_s18 = sphi %s1061_s18, %s1260_s18   ;;  %s1004_s17 = sphi %s1059_s17, %s1259_s17  }
   0x7   : > { %p25_p0 = scmp.ge.s32.totalorder %s24_s3, 2  ;;  %p43_p1 = scmp.ne.s32.totalorder %s1008_s18, %s1004_s17 }
   0x8   : > { %p44_p2 = scmp.eq.s32.totalorder %s1028_s23, 0  ;;  %s36_s28 = sadd.s32 1, %s1008_s18 }
   0x9   : > { %s1266_s3 = smov (%p25_p0, %s24_s3), 0  ;;  %s1268_s24 = smov (!%p25_p0, %s27_s24), %s1024_s22 }
   0xa   : > { %p45_p3 = por %p44_p2, %p43_p1  ;;  %p29_p4 = scmp.ge.s32.totalorder %s1268_s24, 2 }
   0xb   : > { %s32_s25 = ssub.s32 %s1020_s21, %s1266_s3  ;;  %p780_p6 = scmp.ge.s32.totalorder %s1028_s23, 4 }
   0xc   : > { %s1270_s24 = smov (%p29_p4, %s1268_s24), 0 }
   0xd   : > { %s31_s26 = ssub.s32 %s1024_s22, %s1270_s24  ;;  %169 = sbr.rel (%p780_p6) target bundleno = 32 (0x20), region = 24 }
   0xe   : > { %s33_s27 = sor.u32 %s32_s25, %s31_s26 }
   0xf   : > { %p34_p5 = scmp.eq.s32.totalorder %s33_s27, 0 }
  0x11   : > { %s1110_s29 = scalar_select %p34_p5, %s1008_s18, %s36_s28  }
  0x12   : > { %172 = sbr.rel (!%p45_p3) target bundleno = 32 (0x20), region = 28  ;;  %s174_s30 = sand.u32 (%p45_p3), 1, %s1008_s18  }
  0x13   : > { %s796_s5 = sshll.u32 (%p45_p3), %s1024_s22, 5  ;;  %s781_s6 = sshll.u32 (%p45_p3), %s174_s30, 7 }
  0x14   : > { %s179_s7 = sadd.s32 (%p45_p3), %s1020_s21, %s796_s5  ;;  %s176_s12 = scalar_lea.vmem (%p45_p3), [#allocation4], %s781_s6 }
  0x15   : > { %s784_s8 = sshll.u32 (%p45_p3), %s179_s7, 3 }
  0x16   : > { %s1119_s11 = scalar_lea.vmem (%p45_p3), %s1254_s0, %s784_s8 }
  0x17   : > { %v240_v0 = vld [vmem:[%s1119_s11] sm:$0xff]  ;;  %v242_v1 = vld [vmem:[%s1119_s11 + $0x10] sm:$0xff] }
  0x18   : > { %v244_v2 = vld [vmem:[%s1119_s11 + $0x20] sm:$0xff]  ;;  %241 = vst [vmem:[%s176_s12] sm:$0xff] %v240_v0  ;;  %243 = vst [vmem:[%s176_s12 + $0x8] sm:$0xff] %v242_v1  ;;  %v246_v3 = vld [vmem:[%s1119_s11 + $0x30] sm:$0xff] }
  0x19   : > { %245 = vst [vmem:[%s176_s12 + $0x10] sm:$0xff] %v244_v2  ;;  %v248_v4 = vld [vmem:[%s1119_s11 + $0x40] sm:$0xff]  ;;  %v250_v5 = vld [vmem:[%s1119_s11 + $0x50] sm:$0xff]  ;;  %247 = vst [vmem:[%s176_s12 + $0x18] sm:$0xff] %v246_v3 }
  0x1a   : > { %249 = vst [vmem:[%s176_s12 + $0x20] sm:$0xff] %v248_v4  ;;  %251 = vst [vmem:[%s176_s12 + $0x28] sm:$0xff] %v250_v5  ;;  %v252_v6 = vld [vmem:[%s1119_s11 + $0x60] sm:$0xff]  ;;  %v254_v7 = vld [vmem:[%s1119_s11 + $0x70] sm:$0xff] }
  0x1b   : > { %v256_v8 = vld [vmem:[%s1119_s11 + $0x80] sm:$0xff]  ;;  %253 = vst [vmem:[%s176_s12 + $0x30] sm:$0xff] %v252_v6  ;;  %255 = vst [vmem:[%s176_s12 + $0x38] sm:$0xff] %v254_v7  ;;  %v258_v9 = vld [vmem:[%s1119_s11 + $0x90] sm:$0xff] }
  0x1c   : > { %257 = vst [vmem:[%s176_s12 + $0x40] sm:$0xff] %v256_v8  ;;  %v260_v10 = vld [vmem:[%s1119_s11 + $0xa0] sm:$0xff]  ;;  %v262_v11 = vld [vmem:[%s1119_s11 + $0xb0] sm:$0xff]  ;;  %259 = vst [vmem:[%s176_s12 + $0x48] sm:$0xff] %v258_v9 }
  0x1d   : > { %261 = vst [vmem:[%s176_s12 + $0x50] sm:$0xff] %v260_v10  ;;  %263 = vst [vmem:[%s176_s12 + $0x58] sm:$0xff] %v262_v11  ;;  %v264_v12 = vld [vmem:[%s1119_s11 + $0xc0] sm:$0xff]  ;;  %v266_v13 = vld [vmem:[%s1119_s11 + $0xd0] sm:$0xff] }
  0x1e   : > { %v268_v14 = vld [vmem:[%s1119_s11 + $0xe0] sm:$0xff]  ;;  %265 = vst [vmem:[%s176_s12 + $0x60] sm:$0xff] %v264_v12  ;;  %267 = vst [vmem:[%s176_s12 + $0x68] sm:$0xff] %v266_v13  ;;  %v270_v15 = vld [vmem:[%s1119_s11 + $0xf0] sm:$0xff] }
  0x1f   : > { %269 = vst [vmem:[%s176_s12 + $0x70] sm:$0xff] %v268_v14  ;;  %271 = vst [vmem:[%s176_s12 + $0x78] sm:$0xff] %v270_v15 }
  0x20 PF: > { %p785_p7 = scmp.ge.s32.totalorder %s1028_s23, 1  ;;  %p285_p8 = scmp.lt.s32.totalorder %s1028_s23, 5 }
  0x22   : > { %p286_p9 = pnand %p785_p7, %p285_p8 }
  0x23   : > { %s292_s13 = sand.u32 (!%p286_p9), 1, %s1004_s17   ;;  %s787_s14 = sshll.u32 (!%p286_p9), %s1012_s19, 4 }
  0x24   : > { %289 = sbr.rel (%p286_p9) target bundleno = 322 (0x142), region = 70  ;;  %s786_s15 = sshll.u32 (!%p286_p9), %s292_s13, 7 }
  0x25   : > { %p324_p10 = scmp.lt.s32.totalorder (!%p286_p9), %s787_s14, 31  ;;  %s789_s16 = sshll.u32 (!%p286_p9), %s1016_s20, 4 }
  0x26   : > { %p330_p11 = scmp.lt.s32.totalorder (!%p286_p9), %s789_s16, 31  ;;  %s1152_s17 = scalar_lea.vmem (!%p286_p9), [#allocation4], %s786_s15 }
  0x27   : > { %p791_p12 = scmp.ne.s32.totalorder (!%p286_p9), %s1012_s19, 0 }
  0x29   : > { %s1272_s14 = smov (!%p324_p10, %s787_s14), 31  ;;  %s1274_s16 = smov (!%p330_p11, %s789_s16), 31 }
  0x2a   : > { %s788_s25 = sshll.u32 %s1272_s14, 3  ;;  %s790_s30 = sshll.u32 %s1274_s16, 3 }
  0x2b   : > { %s1145_s28 = scalar_lea.vmem %s1255_s1, %s788_s25  ;;  %s1150_s7 = scalar_lea.vmem %s1258_s4, %s790_s30 }
  0x2c   : > { %338 = sbr.rel (%p791_p12) target bundleno = 58 (0x3a), region = 78 }
  0x31   : > { %v1030_v16 = vmov 0.0  }
  0x32   : > { %339 = vst [vmem:[#allocation2 + $0x30] sm:$0xff] %v1030_v16  ;;  %340 = vst [vmem:[#allocation2] sm:$0xff] %v1030_v16 }
  0x33   : > { %341 = vst [vmem:[#allocation2 + $0x58] sm:$0xff] %v1030_v16  ;;  %342 = vst [vmem:[#allocation2 + $0x18] sm:$0xff] %v1030_v16 }
  0x34   : > { %343 = vst [vmem:[#allocation2 + $0x50] sm:$0xff] %v1030_v16  ;;  %344 = vst [vmem:[#allocation2 + $0x68] sm:$0xff] %v1030_v16 }
  0x35   : > { %345 = vst [vmem:[#allocation2 + $0x8] sm:$0xff] %v1030_v16  ;;  %346 = vst [vmem:[#allocation2 + $0x48] sm:$0xff] %v1030_v16 }
  0x36   : > { %347 = vst [vmem:[#allocation2 + $0x40] sm:$0xff] %v1030_v16  ;;  %348 = vst [vmem:[#allocation2 + $0x20] sm:$0xff] %v1030_v16 }
  0x37   : > { %349 = vst [vmem:[#allocation2 + $0x10] sm:$0xff] %v1030_v16  ;;  %350 = vst [vmem:[#allocation2 + $0x38] sm:$0xff] %v1030_v16 }
  0x38   : > { %351 = vst [vmem:[#allocation2 + $0x60] sm:$0xff] %v1030_v16  ;;  %352 = vst [vmem:[#allocation2 + $0x70] sm:$0xff] %v1030_v16 }
  0x39   : > { %353 = vst [vmem:[#allocation2 + $0x78] sm:$0xff] %v1030_v16  ;;  %354 = vst [vmem:[#allocation2 + $0x28] sm:$0xff] %v1030_v16 }
  0x3a PF: > { %v402_v17 = vld [vmem:[%s1145_s28 + $0x78] sm:$0xff]  ;;  %v401_v18 = vld [vmem:[%s1145_s28 + $0x70] sm:$0xff]  ;;  %v400_v19 = vld [vmem:[%s1145_s28 + $0x68] sm:$0xff]  ;;  %p792_p13 = scmp.ne.s32.totalorder %s1012_s19, 1 }
  0x3b   : > { %829 = vmatprep.subr.mxu0 %v402_v17  ;;  %885 = vmatprep.subr.mxu1 %v402_v17  ;;  %v399_v20 = vld [vmem:[%s1145_s28 + $0x60] sm:$0xff]  ;;  %v398_v21 = vld [vmem:[%s1145_s28 + $0x58] sm:$0xff]  ;;  %v397_v22 = vld [vmem:[%s1145_s28 + $0x50] sm:$0xff]  ;;  %s623_s9 = sld [smem:[#allocation3]] (!%p792_p13) }
  0x3c   : > { %830 = vmatpush3.msra.mxu0 %v402_v17  ;;  %901 = vmatpush3.msra.mxu1 %v402_v17  ;;  %v396_v23 = vld [vmem:[%s1145_s28 + $0x48] sm:$0xff]  ;;  %v395_v24 = vld [vmem:[%s1145_s28 + $0x40] sm:$0xff]  ;;  %v394_v25 = vld [vmem:[%s1145_s28 + $0x38] sm:$0xff] }
  0x3d   : > { %831 = vmatprep.subr.mxu0 %v401_v18  ;;  %886 = vmatprep.subr.mxu1 %v401_v18  ;;  %v393_v26 = vld [vmem:[%s1145_s28 + $0x30] sm:$0xff]  ;;  %v392_v27 = vld [vmem:[%s1145_s28 + $0x28] sm:$0xff]  ;;  %v391_v28 = vld [vmem:[%s1145_s28 + $0x20] sm:$0xff] }
  0x3e   : > { %832 = vmatpush3.msra.mxu0 %v401_v18  ;;  %902 = vmatpush3.msra.mxu1 %v401_v18  ;;  %v390_v29 = vld [vmem:[%s1145_s28 + $0x18] sm:$0xff]  ;;  %v389_v30 = vld [vmem:[%s1145_s28 + $0x10] sm:$0xff]  ;;  %v388_v31 = vld [vmem:[%s1145_s28 + $0x8] sm:$0xff] }
  0x3f   : > { %833 = vmatprep.subr.mxu0 %v400_v19  ;;  %887 = vmatprep.subr.mxu1 %v400_v19  ;;  %v387_v32 = vld [vmem:[%s1145_s28] sm:$0xff]  ;;  %v372_v35 = vld [vmem:[%s1152_s17 + $0x8] sm:$0xff]  ;;  %v373_v37 = vld [vmem:[%s1152_s17 + $0x10] sm:$0xff] }
  0x40   : > { %834 = vmatpush3.msra.mxu0 %v400_v19  ;;  %903 = vmatpush3.msra.mxu1 %v400_v19  ;;  %v371_v33 = vld [vmem:[%s1152_s17] sm:$0xff]  ;;  %v380_v36 = vld [vmem:[%s1152_s17 + $0x48] sm:$0xff]  ;;  %v381_v38 = vld [vmem:[%s1152_s17 + $0x50] sm:$0xff] }
  0x41   : > { %835 = vmatprep.subr.mxu0 %v399_v20  ;;  %888 = vmatprep.subr.mxu1 %v399_v20  ;;  %v379_v34 = vld [vmem:[%s1152_s17 + $0x40] sm:$0xff]  ;;  %v374_v39 = vld [vmem:[%s1152_s17 + $0x18] sm:$0xff]  ;;  %v376_v43 = vld [vmem:[%s1152_s17 + $0x28] sm:$0xff] }
  0x42   : > { %836 = vmatpush3.msra.mxu0 %v399_v20  ;;  %904 = vmatpush3.msra.mxu1 %v399_v20  ;;  %v382_v40 = vld [vmem:[%s1152_s17 + $0x58] sm:$0xff]  ;;  %v375_v41 = vld [vmem:[%s1152_s17 + $0x20] sm:$0xff]  ;;  %v384_v44 = vld [vmem:[%s1152_s17 + $0x68] sm:$0xff] }
  0x43   : > { %837 = vmatprep.subr.mxu0 %v398_v21  ;;  %889 = vmatprep.subr.mxu1 %v398_v21  ;;  %v383_v42 = vld [vmem:[%s1152_s17 + $0x60] sm:$0xff]  ;;  %v377_v45 = vld [vmem:[%s1152_s17 + $0x30] sm:$0xff]  ;;  %v378_v47 = vld [vmem:[%s1152_s17 + $0x38] sm:$0xff] }
  0x44   : > { %838 = vmatpush3.msra.mxu0 %v398_v21  ;;  %905 = vmatpush3.msra.mxu1 %v398_v21  ;;  %v385_v46 = vld [vmem:[%s1152_s17 + $0x70] sm:$0xff]  ;;  %v386_v48 = vld [vmem:[%s1152_s17 + $0x78] sm:$0xff]  ;;  %v356_v49 = vld [vmem:[#allocation2] sm:$0xff] }
  0x45   : > { %839 = vmatprep.subr.mxu0 %v397_v22  ;;  %890 = vmatprep.subr.mxu1 %v397_v22  ;;  %v364_v50 = vld [vmem:[#allocation2 + $0x20] sm:$0xff]  ;;  %v355_v53 = vld [vmem:[#allocation2 + $0x30] sm:$0xff]  ;;  %v358_v59 = vld [vmem:[#allocation2 + $0x18] sm:$0xff] }
  0x46   : > { %840 = vmatpush3.msra.mxu0 %v397_v22  ;;  %906 = vmatpush3.msra.mxu1 %v397_v22  ;;  %v363_v54 = vld [vmem:[#allocation2 + $0x40] sm:$0xff]  ;;  %v366_v60 = vld [vmem:[#allocation2 + $0x38] sm:$0xff]  ;;  %v365_v2 = vld [vmem:[#allocation2 + $0x10] sm:$0xff] }
  0x47   : > { %841 = vmatprep.subr.mxu0 %v396_v23  ;;  %891 = vmatprep.subr.mxu1 %v396_v23  ;;  %v357_v1 = vld [vmem:[#allocation2 + $0x58] sm:$0xff]  ;;  %v360_v7 = vld [vmem:[#allocation2 + $0x68] sm:$0xff]  ;;  %v368_v8 = vld [vmem:[#allocation2 + $0x70] sm:$0xff] }
  0x48   : > { %842 = vmatpush3.msra.mxu0 %v396_v23  ;;  %907 = vmatpush3.msra.mxu1 %v396_v23  ;;  %v359_v13 = vld [vmem:[#allocation2 + $0x50] sm:$0xff]  ;;  %v367_v14 = vld [vmem:[#allocation2 + $0x60] sm:$0xff]  ;;  %v362_v19 = vld [vmem:[#allocation2 + $0x48] sm:$0xff] }
  0x49   : > { %843 = vmatprep.subr.mxu0 %v395_v24  ;;  %892 = vmatprep.subr.mxu1 %v395_v24  ;;  %v370_v20 = vld [vmem:[#allocation2 + $0x28] sm:$0xff] }
  0x4a   : > { %844 = vmatpush3.msra.mxu0 %v395_v24  ;;  %908 = vmatpush3.msra.mxu1 %v395_v24 }
  0x4b   : > { %845 = vmatprep.subr.mxu0 %v394_v25  ;;  %893 = vmatprep.subr.mxu1 %v394_v25 }
  0x4c   : > { %846 = vmatpush3.msra.mxu0 %v394_v25  ;;  %909 = vmatpush3.msra.mxu1 %v394_v25  ;;  %v361_v25 = vld [vmem:[#allocation2 + $0x8] sm:$0xff] }
  0x4d   : > { %847 = vmatprep.subr.mxu0 %v393_v26  ;;  %894 = vmatprep.subr.mxu1 %v393_v26 }
  0x4e   : > { %848 = vmatpush3.msra.mxu0 %v393_v26  ;;  %910 = vmatpush3.msra.mxu1 %v393_v26  ;;  %v369_v26 = vld [vmem:[#allocation2 + $0x78] sm:$0xff] }
  0x4f   : > { %849 = vmatprep.subr.mxu0 %v392_v27  ;;  %895 = vmatprep.subr.mxu1 %v392_v27 }
  0x50   : > { %850 = vmatpush3.msra.mxu0 %v392_v27  ;;  %911 = vmatpush3.msra.mxu1 %v392_v27 }
  0x51   : > { %851 = vmatprep.subr.mxu0 %v391_v28  ;;  %896 = vmatprep.subr.mxu1 %v391_v28 }
  0x52   : > { %852 = vmatpush3.msra.mxu0 %v391_v28  ;;  %912 = vmatpush3.msra.mxu1 %v391_v28 }
  0x53   : > { %853 = vmatprep.subr.mxu0 %v390_v29  ;;  %897 = vmatprep.subr.mxu1 %v390_v29 }
  0x54   : > { %854 = vmatpush3.msra.mxu0 %v390_v29  ;;  %913 = vmatpush3.msra.mxu1 %v390_v29 }
  0x55   : > { %855 = vmatprep.subr.mxu0 %v389_v30  ;;  %898 = vmatprep.subr.mxu1 %v389_v30 }
  0x56   : > { %856 = vmatpush3.msra.mxu0 %v389_v30  ;;  %914 = vmatpush3.msra.mxu1 %v389_v30 }
  0x57   : > { %857 = vmatprep.subr.mxu0 %v388_v31  ;;  %899 = vmatprep.subr.mxu1 %v388_v31 }
  0x58   : > { %858 = vmatpush3.msra.mxu0 %v388_v31  ;;  %915 = vmatpush3.msra.mxu1 %v388_v31 }
  0x59   : > { %859 = vmatprep.subr.mxu0 %v387_v32  ;;  %900 = vmatprep.subr.mxu1 %v387_v32 }
  0x5a   : > { %860 = vmatpush3.msra.mxu0 %v387_v32  ;;  %916 = vmatpush3.msra.mxu1 %v387_v32 }
  0x5b   : > { %861 = vmatprep.mubr.f32.mxu0 %v371_v33  ;;  %873 = vmatprep.mubr.f32.mxu1 %v379_v34 }
  0x5c   : > { %862 = vmatmul.mubr.f32.vlgmr.msra.gmra.mxu0 %v372_v35  ;;  %874 = vmatmul.mubr.f32.vlgmr.msra.gmra.mxu1 %v380_v36 }
  0x5d   : > { %864 = vmatprep.mubr.f32.mxu0 %v373_v37  ;;  %876 = vmatprep.mubr.f32.mxu1 %v381_v38 }
  0x60   : > { %865 = vmatmul.mubr.f32.gmra.mxu0 %v374_v39  ;;  %877 = vmatmul.mubr.f32.gmra.mxu1 %v382_v40 }
  0x61   : > { %867 = vmatprep.mubr.f32.mxu0 %v375_v41  ;;  %879 = vmatprep.mubr.f32.mxu1 %v383_v42 }
  0x64   : > { %868 = vmatmul.mubr.f32.gmra.mxu0 %v376_v43  ;;  %880 = vmatmul.mubr.f32.gmra.mxu1 %v384_v44 }
  0x65   : > { %870 = vmatprep.mubr.f32.mxu0 %v377_v45  ;;  %882 = vmatprep.mubr.f32.mxu1 %v385_v46 }
  0x68   : > { %871 = vmatmul.mubr.f32.gmra.mxu0 %v378_v47  ;;  %883 = vmatmul.mubr.f32.gmra.mxu1 %v386_v48 }
 0x11c   : > { %v863_v51 = vpop.f32.mrf.mxu0  ;;  %v875_v52 = vpop.f32.mrf.mxu1 }
 0x11d   : > { %v549_v55 = vadd.f32 %v863_v51, %v356_v49  ;;  %v557_v56 = vadd.f32 %v875_v52, %v364_v50 }
 0x11e   : > { %v469_v57 = vpop.f32.mrf.mxu0  ;;  %v509_v58 = vpop.f32.mrf.mxu1 }
 0x11f   : > { %565 = vst [vmem:[#allocation2] sm:$0xff] %v549_v55  ;;  %573 = vst [vmem:[#allocation2 + $0x20] sm:$0xff] %v557_v56  ;;  %v548_v61 = vadd.f32 %v469_v57, %v355_v53  ;;  %v556_v62 = vadd.f32 %v509_v58, %v363_v54 }
 0x120   : > { %v866_v63 = vpop.f32.mrf.mxu0  ;;  %v878_v0 = vpop.f32.mrf.mxu1 }
 0x121   : > { %564 = vst [vmem:[#allocation2 + $0x30] sm:$0xff] %v548_v61  ;;  %572 = vst [vmem:[#allocation2 + $0x40] sm:$0xff] %v556_v62  ;;  %v551_v3 = vadd.f32 %v866_v63, %v358_v59  ;;  %v559_v4 = vadd.f32 %v878_v0, %v366_v60 }
 0x122   : > { %v479_v5 = vpop.f32.mrf.mxu0  ;;  %v519_v6 = vpop.f32.mrf.mxu1 }
 0x123   : > { %567 = vst [vmem:[#allocation2 + $0x18] sm:$0xff] %v551_v3  ;;  %575 = vst [vmem:[#allocation2 + $0x38] sm:$0xff] %v559_v4  ;;  %v550_v9 = vadd.f32 %v479_v5, %v357_v1  ;;  %v558_v10 = vadd.f32 %v519_v6, %v365_v2 }
 0x124   : > { %v869_v11 = vpop.f32.mrf.mxu0  ;;  %v881_v12 = vpop.f32.mrf.mxu1 }
 0x125   : > { %566 = vst [vmem:[#allocation2 + $0x58] sm:$0xff] %v550_v9  ;;  %574 = vst [vmem:[#allocation2 + $0x10] sm:$0xff] %v558_v10  ;;  %v553_v15 = vadd.f32 %v869_v11, %v360_v7  ;;  %v561_v16 = vadd.f32 %v881_v12, %v368_v8 }
 0x126   : > { %v489_v17 = vpop.f32.mrf.mxu0  ;;  %v529_v18 = vpop.f32.mrf.mxu1 }
 0x127   : > { %569 = vst [vmem:[#allocation2 + $0x68] sm:$0xff] %v553_v15  ;;  %577 = vst [vmem:[#allocation2 + $0x70] sm:$0xff] %v561_v16  ;;  %v552_v21 = vadd.f32 %v489_v17, %v359_v13  ;;  %v560_v22 = vadd.f32 %v529_v18, %v367_v14 }
 0x128   : > { %v872_v23 = vpop.f32.mrf.mxu0  ;;  %v884_v24 = vpop.f32.mrf.mxu1 }
 0x129   : > { %568 = vst [vmem:[#allocation2 + $0x50] sm:$0xff] %v552_v21  ;;  %576 = vst [vmem:[#allocation2 + $0x60] sm:$0xff] %v560_v22  ;;  %v555_v27 = vadd.f32 %v872_v23, %v362_v19  ;;  %v563_v28 = vadd.f32 %v884_v24, %v370_v20  ;;  %583 = sbr.rel (%p792_p13) target bundleno = 322 (0x142), region = 82 }
 0x12a   : > { %v499_v29 = vpop.f32.mrf.mxu0  ;;  %v539_v30 = vpop.f32.mrf.mxu1 }
 0x12b   : > { %571 = vst [vmem:[#allocation2 + $0x48] sm:$0xff] %v555_v27  ;;  %579 = vst [vmem:[#allocation2 + $0x28] sm:$0xff] %v563_v28  ;;  %v554_v31 = vadd.f32 %v499_v29, %v361_v25  ;;  %v562_v32 = vadd.f32 %v539_v30, %v369_v26 }
 0x12d   : > { %570 = vst [vmem:[#allocation2 + $0x8] sm:$0xff] %v554_v31  ;;  %578 = vst [vmem:[#allocation2 + $0x78] sm:$0xff] %v562_v32 }
 0x12e   : > { %v584_v33 = vld [vmem:[#allocation2 + $0x30] sm:$0xff]  ;;  %v1191_v34 = vld [vmem:[%s1256_s2] ss:$0 sm:$0xff]  ;;  %v586_v38 = vld [vmem:[#allocation2 + $0x58] sm:$0xff]  ;;  %v640_v56 = vstv %s623_s9 }
 0x12f   : > { %v585_v35 = vld [vmem:[#allocation2] sm:$0xff]  ;;  %v607_v36 = vadd.f32 %v1191_v34, %v584_v33  ;;  %v587_v39 = vld [vmem:[#allocation2 + $0x18] sm:$0xff]  ;;  %v609_v41 = vadd.f32 %v1191_v34, %v586_v38  ;;  %v589_v44 = vld [vmem:[#allocation2 + $0x68] sm:$0xff] }
 0x130   : > { %v608_v37 = vadd.f32 %v1191_v34, %v585_v35  ;;  %v588_v40 = vld [vmem:[#allocation2 + $0x50] sm:$0xff]  ;;  %v610_v42 = vadd.f32 %v1191_v34, %v587_v39  ;;  %v612_v47 = vadd.f32 %v1191_v34, %v589_v44  ;;  %v592_v49 = vld [vmem:[#allocation2 + $0x40] sm:$0xff]  ;;  %v595_v53 = vld [vmem:[#allocation2 + $0x38] sm:$0xff] }
 0x131   : > { %v611_v43 = vadd.f32 %v1191_v34, %v588_v40  ;;  %vm624_vm0 = vcmp.ge.f32.partialorder %v607_v36, 0.0  ;;  %v593_v50 = vld [vmem:[#allocation2 + $0x20] sm:$0xff]  ;;  %v594_v51 = vld [vmem:[#allocation2 + $0x10] sm:$0xff]  ;;  %vm626_vm2 = vcmp.ge.f32.partialorder %v609_v41, 0.0  ;;  %v615_v54 = vadd.f32 %v1191_v34, %v592_v49 }
 0x132   : > { %v591_v46 = vld [vmem:[#allocation2 + $0x48] sm:$0xff]  ;;  %vm625_vm1 = vcmp.ge.f32.partialorder %v608_v37, 0.0  ;;  %vm627_vm3 = vcmp.ge.f32.partialorder %v610_v42, 0.0  ;;  %vm629_vm5 = vcmp.ge.f32.partialorder %v612_v47, 0.0  ;;  %v616_v55 = vadd.f32 %v1191_v34, %v593_v50  ;;  %v596_v11 = vld [vmem:[#allocation2 + $0x60] sm:$0xff]  ;;  %v597_v12 = vld [vmem:[#allocation2 + $0x70] sm:$0xff] }
 0x133   : > { %vm628_vm4 = vcmp.ge.f32.partialorder %v611_v43, 0.0  ;;  %v614_v52 = vadd.f32 %v1191_v34, %v591_v46  ;;  %v617_v57 = vadd.f32 %v1191_v34, %v594_v51  ;;  %v618_v58 = vadd.f32 %v1191_v34, %v595_v53  ;;  %v599_v16 = vld [vmem:[#allocation2 + $0x28] sm:$0xff] }
 0x134   : > { %v590_v45 = vld [vmem:[#allocation2 + $0x8] sm:$0xff]  ;;  %v641_v59 = vmul.f32 %v640_v56, %v607_v36  ;;  %v642_v60 = vmul.f32 %v640_v56, %v608_v37  ;;  %v643_v61 = vmul.f32 %v640_v56, %v609_v41  ;;  %v644_v62 = vmul.f32 %v640_v56, %v610_v42  ;;  %v598_v15 = vld [vmem:[#allocation2 + $0x78] sm:$0xff] }
 0x135   : > { %v613_v48 = vadd.f32 %v1191_v34, %v590_v45  ;;  %vm631_vm7 = vcmp.ge.f32.partialorder %v614_v52, 0.0  ;;  %v645_v63 = vmul.f32 %v640_v56, %v611_v43  ;;  %v646_v0 = vmul.f32 %v640_v56, %v612_v47 }
 0x136   : > { %v648_v2 = vmul.f32 %v640_v56, %v614_v52  ;;  %v657_v3 = vsel %vm624_vm0, %v607_v36, %v641_v59  ;;  %v658_v4 = vsel %vm625_vm1, %v608_v37, %v642_v60  ;;  %v659_v5 = vsel %vm626_vm2, %v609_v41, %v643_v61 }
 0x137   : > { %vm630_vm6 = vcmp.ge.f32.partialorder %v613_v48, 0.0  ;;  %v647_v1 = vmul.f32 %v640_v56, %v613_v48  ;;  %v660_v6 = vsel %vm627_vm3, %v610_v42, %v644_v62  ;;  %673 = vst [vmem:[%s1150_s7] sm:$0xff] %v657_v3  ;;  %674 = vst [vmem:[%s1150_s7 + $0x8] sm:$0xff] %v658_v4  ;;  %v661_v7 = vsel %vm628_vm4, %v611_v43, %v645_v63 }
 0x138   : > { %675 = vst [vmem:[%s1150_s7 + $0x10] sm:$0xff] %v659_v5  ;;  %676 = vst [vmem:[%s1150_s7 + $0x18] sm:$0xff] %v660_v6  ;;  %v662_v8 = vsel %vm629_vm5, %v612_v47, %v646_v0  ;;  %v664_v10 = vsel %vm631_vm7, %v614_v52, %v648_v2  ;;  %vm632_vm8 = vcmp.ge.f32.partialorder %v615_v54, 0.0  ;;  %v649_v13 = vmul.f32 %v640_v56, %v615_v54 }
 0x139   : > { %v663_v9 = vsel %vm630_vm6, %v613_v48, %v647_v1  ;;  %677 = vst [vmem:[%s1150_s7 + $0x20] sm:$0xff] %v661_v7  ;;  %678 = vst [vmem:[%s1150_s7 + $0x28] sm:$0xff] %v662_v8  ;;  %vm633_vm9 = vcmp.ge.f32.partialorder %v616_v55, 0.0  ;;  %v650_v14 = vmul.f32 %v640_v56, %v616_v55  ;;  %vm634_vm10 = vcmp.ge.f32.partialorder %v617_v57, 0.0 }
 0x13a   : > { %679 = vst [vmem:[%s1150_s7 + $0x30] sm:$0xff] %v663_v9  ;;  %680 = vst [vmem:[%s1150_s7 + $0x38] sm:$0xff] %v664_v10  ;;  %v651_v17 = vmul.f32 %v640_v56, %v617_v57  ;;  %vm635_vm11 = vcmp.ge.f32.partialorder %v618_v58, 0.0  ;;  %v652_v18 = vmul.f32 %v640_v56, %v618_v58  ;;  %v665_v19 = vsel %vm632_vm8, %v615_v54, %v649_v13 }
 0x13b   : > { %v666_v20 = vsel %vm633_vm9, %v616_v55, %v650_v14  ;;  %v619_v21 = vadd.f32 %v1191_v34, %v596_v11  ;;  %v620_v22 = vadd.f32 %v1191_v34, %v597_v12  ;;  %681 = vst [vmem:[%s1150_s7 + $0x40] sm:$0xff] %v665_v19  ;;  %v621_v25 = vadd.f32 %v1191_v34, %v598_v15 }
 0x13c   : > { %682 = vst [vmem:[%s1150_s7 + $0x48] sm:$0xff] %v666_v20  ;;  %v667_v23 = vsel %vm634_vm10, %v617_v57, %v651_v17  ;;  %v668_v24 = vsel %vm635_vm11, %v618_v58, %v652_v18  ;;  %v622_v26 = vadd.f32 %v1191_v34, %v599_v16 }
 0x13d   : > { %683 = vst [vmem:[%s1150_s7 + $0x50] sm:$0xff] %v667_v23  ;;  %684 = vst [vmem:[%s1150_s7 + $0x58] sm:$0xff] %v668_v24  ;;  %vm636_vm12 = vcmp.ge.f32.partialorder %v619_v21, 0.0  ;;  %v653_v27 = vmul.f32 %v640_v56, %v619_v21  ;;  %vm637_vm13 = vcmp.ge.f32.partialorder %v620_v22, 0.0  ;;  %v654_v28 = vmul.f32 %v640_v56, %v620_v22 }
 0x13e   : > { %vm638_vm14 = vcmp.ge.f32.partialorder %v621_v25, 0.0  ;;  %v655_v29 = vmul.f32 %v640_v56, %v621_v25  ;;  %vm639_vm15 = vcmp.ge.f32.partialorder %v622_v26, 0.0  ;;  %v656_v30 = vmul.f32 %v640_v56, %v622_v26 }
 0x13f   : > { %v669_v31 = vsel %vm636_vm12, %v619_v21, %v653_v27  ;;  %v670_v32 = vsel %vm637_vm13, %v620_v22, %v654_v28 }
 0x140   : > { %685 = vst [vmem:[%s1150_s7 + $0x60] sm:$0xff] %v669_v31  ;;  %686 = vst [vmem:[%s1150_s7 + $0x68] sm:$0xff] %v670_v32  ;;  %v671_v33 = vsel %vm638_vm14, %v621_v25, %v655_v29  ;;  %v672_v35 = vsel %vm639_vm15, %v622_v26, %v656_v30 }
 0x141   : > { %687 = vst [vmem:[%s1150_s7 + $0x70] sm:$0xff] %v671_v33  ;;  %688 = vst [vmem:[%s1150_s7 + $0x78] sm:$0xff] %v672_v35 }
 0x142 PF: > { %s15_s23 = sadd.s32 1, %s1028_s23   ;;  %s1259_s17 = smov %s1008_s18 }
 0x143   : > { %p12_p0 = scmp.ge.s32.totalorder %s15_s23, 6   ;;  %s1260_s18 = smov %s1110_s29 }
 0x144   : > { %s1261_s19 = smov %s1020_s21  ;;  %s1262_s20 = smov %s1024_s22 }
 0x145   : > { %s1263_s21 = smov %s1266_s3  ;;  %s1264_s22 = smov %s1270_s24 }
 0x146   :  { %14 = sbr.rel (!%p12_p0) target bundleno = 6 (0x6), region = 120 }

</bundles_post_ra>
